<compile_context>
chip_gen: v7x
topology: tpu7x:2x2x1
jax: 0.10.0
libtpu: 0.0.40
codegen_flags: <defaults>
</compile_context>

<pallas_src>
import jax
import jax.numpy as jnp
from jax.experimental import pallas as pl

N_CLASSES = 2
N_ENVS = 2

# Pinned matmul precision (feedback #8). DEFAULT = fast bf16-operand MXU path;
# set to jax.lax.Precision.HIGHEST for full f32 fidelity (both the kernel and
# the self-test reference use this constant, so the check stays consistent).
_MM_PRECISION = jax.lax.Precision.DEFAULT


def _softplus(x):
    # numerically-stable softplus (VPU + EUP ops)
    return jnp.maximum(x, 0.0) + jnp.log1p(jnp.exp(-jnp.abs(x)))


# ---------------- fused covariance-table kernel (single launch, no grid) -----
def _cov_table_kernel(off_p_ref, diag_p_ref, off_c_ref, diag_c_ref, cov_ref):
    # off_p_ref : (Z, Z)       parent off-diagonal factor
    # diag_p_ref: (Z, 1)       parent raw diagonal (column layout -> broadcasts
    #                          straight onto the matrix diagonal, no relayout)
    # off_c_ref : (CE, Z, Z)   child off-diagonal factors
    # diag_c_ref: (CE, Z, 1)   child raw diagonals (column layout)
    # cov_ref   : (1+CE, Z, Z) output covariance table
    z = off_p_ref.shape[-1]
    ce = off_c_ref.shape[0]

    # One small (Z, Z) identity mask shared by every table row (feedback #4).
    row = jax.lax.broadcasted_iota(jnp.int32, (z, z), 0)
    col = jax.lax.broadcasted_iota(jnp.int32, (z, z), 1)
    eye = row == col

    # ---- row 0: parent covariance -------------------------------------
    lp = off_p_ref[...]                                            # (Z, Z)
    cov_p = jax.lax.dot_general(
        lp, lp, (((1,), (1,)), ((), ())),                          # Lp @ Lp.T
        preferred_element_type=jnp.float32, precision=_MM_PRECISION)
    dp = _softplus(diag_p_ref[...])                                # (Z, 1)
    cov_ref[0] = cov_p + jnp.where(eye, dp, 0.0)

    # ---- rows 1..CE: child covariances (one batched MXU contraction) ---
    lc = off_c_ref[...]                                            # (CE, Z, Z)
    cov_c = jax.lax.dot_general(
        lc, lc, (((2,), (2,)), ((0,), (0,))),                      # Lc @ Lc.T
        preferred_element_type=jnp.float32, precision=_MM_PRECISION)
    dc = _softplus(diag_c_ref[...])                                # (CE, Z, 1)
    cov_ref[pl.ds(1, ce)] = cov_c + jnp.where(eye, dc, 0.0)


def build_cov_table(off_parent, diag_parent_col, off_child, diag_child_col):
    # off_parent:(Z,Z)  diag_parent_col:(Z,1)  off_child:(CE,Z,Z)  diag_child_col:(CE,Z,1)
    z = off_parent.shape[0]
    ce = off_child.shape[0]
    nt = ce + 1
    cost = pl.CostEstimate(                                        # feedback #5
        flops=2 * nt * z * z * z,
        transcendentals=2 * nt * z,
        bytes_accessed=4 * (2 * nt * z * z + 2 * nt * z),
    )
    # Gridless call: every operand is a full-array VMEM block (~6 KB total).
    return pl.pallas_call(
        _cov_table_kernel,
        out_shape=jax.ShapeDtypeStruct((nt, z, z), jnp.float32),
        cost_estimate=cost,
    )(off_parent, diag_parent_col, off_child, diag_child_col)


# ----------------- Prior module ----------------------------------------------
class Prior:
    def __init__(self, z_size, init_sd, key):
        ks = jax.random.split(key, 6)
        f32 = jnp.float32
        self.mu_parent = init_sd * jax.random.normal(ks[0], (z_size,), f32)
        self.offdiag_parent = init_sd * jax.random.normal(ks[1], (z_size, z_size), f32)
        self.diag_parent = init_sd * jax.random.normal(ks[2], (z_size,), f32)
        self.mu_child = init_sd * jax.random.normal(ks[3], (N_CLASSES, N_ENVS, z_size), f32)
        self.offdiag_child = init_sd * jax.random.normal(
            ks[4], (N_CLASSES, N_ENVS, z_size, z_size), f32)
        self.diag_child = init_sd * jax.random.normal(ks[5], (N_CLASSES, N_ENVS, z_size), f32)

    def forward(self, y, e):
        Z = self.mu_parent.shape[0]
        CE = N_CLASSES * N_ENVS

        # Only free, metadata-only reshapes here — no per-call concatenation
        # or stacking of parameter tables (feedback #1). The kernel computes
        # every distinct covariance exactly once (1 parent + CE children).
        cov_all = build_cov_table(
            self.offdiag_parent,                    # (Z, Z)
            self.diag_parent.reshape(Z, 1),         # (Z, 1)
            self.offdiag_child.reshape(CE, Z, Z),   # (CE, Z, Z)
            self.diag_child.reshape(CE, Z, 1),      # (CE, Z, 1)
        )                                           # -> (1 + CE, Z, Z)

        # parent_dist(batch_size): identical parameters for every example, so
        # return them UNBROADCAST (feedback #7); the consumer broadcasts lazily
        # (an MVN batch_shape expansion is free, duplicated HBM writes are not).
        parent_mu = self.mu_parent                  # (Z,)
        parent_cov = cov_all[0]                     # (Z, Z)

        # child_dist(y, e): per-example gather from the deduplicated table.
        idx = (y * N_ENVS + e).astype(jnp.int32)
        child_mu = self.mu_child.reshape(CE, Z)[idx]
        child_cov = jnp.take(cov_all, idx + 1, axis=0)

        # TODO(synk): torch.distributions.MultivariateNormal (Cholesky factorization
        # + PSD validation) has no Pallas equivalent; we return the (mean, covariance)
        # parameters of each distribution and leave the Cholesky to the consumer.
        return (parent_mu, parent_cov), (child_mu, child_cov)


# ----------------- pure-JAX reference for correctness -------------------------
def _ref_cov(off, diag):
    d = jax.nn.softplus(diag)
    if off.ndim == 2:
        return jnp.dot(off, off.T, precision=_MM_PRECISION) + jnp.diag(d)
    return (jnp.einsum("bij,bkj->bik", off, off, precision=_MM_PRECISION)
            + jax.vmap(jnp.diag)(d))


if __name__ == "__main__":
    key = jax.random.PRNGKey(0)
    pkey, ykey, ekey = jax.random.split(key, 3)
    z_size, init_sd, batch = 16, 0.1, 8

    prior = Prior(z_size, init_sd, pkey)
    y = jax.random.randint(ykey, (batch,), 0, N_CLASSES)
    e = jax.random.randint(ekey, (batch,), 0, N_ENVS)

    (pm, pc), (cm, cc) = prior.forward(y, e)
    jax.block_until_ready((pm, pc, cm, cc))

    # reference (parent compared unbroadcast — same per-row parameters)
    ref_pm = prior.mu_parent
    ref_pc = _ref_cov(prior.offdiag_parent, prior.diag_parent)
    ref_cm = prior.mu_child[y, e]
    ref_cc = _ref_cov(prior.offdiag_child[y, e], prior.diag_child[y, e])

    assert jnp.allclose(pm, ref_pm, atol=1e-5), "parent mu mismatch"
    assert jnp.allclose(pc, ref_pc, atol=1e-5), "parent cov mismatch"
    assert jnp.allclose(cm, ref_cm, atol=1e-5), "child mu mismatch"
    assert jnp.allclose(cc, ref_cc, atol=1e-5), "child cov mismatch"

    print("KERNEL_OK")
</pallas_src>

<mosaic_0001>
module attributes {stable_mosaic.version = 11 : i64} {
  func.func @_cov_table_kernel(%arg0: memref<16x16xf32, #tpu.memory_space<vmem>>, %arg1: memref<16x1xf32, #tpu.memory_space<vmem>>, %arg2: memref<4x16x16xf32, #tpu.memory_space<vmem>>, %arg3: memref<4x16x1xf32, #tpu.memory_space<vmem>>, %arg4: memref<5x16x16xf32, #tpu.memory_space<vmem>>) attributes {dimension_semantics = [], scalar_prefetch = 0 : i64, scratch_operands = 0 : i64, tpu.core_type = #tpu.core_type<tc>} {
    %0 = tpu.iota {dimensions = array<i32: 0>} : vector<16x16xi32>
    %1 = tpu.iota {dimensions = array<i32: 1>} : vector<16x16xi32>
    %2 = arith.cmpi eq, %0, %1 : vector<16x16xi32>
    %c0 = arith.constant 0 : index
    %c0_0 = arith.constant 0 : index
    %3 = vector.load %arg0[%c0, %c0_0] : memref<16x16xf32, #tpu.memory_space<vmem>>, vector<16x16xf32>
    %cst = arith.constant dense<0.000000e+00> : vector<16x16xf32>
    %4 = tpu.matmul %3, %3, %cst {dimension_numbers = #tpu.dot_dimension_numbers<[1], [1], [0], [0], [0, 0, 1, 0], [], []>} : vector<16x16xf32>, vector<16x16xf32>, vector<16x16xf32> -> vector<16x16xf32>
    %c0_1 = arith.constant 0 : index
    %c0_2 = arith.constant 0 : index
    %5 = vector.load %arg1[%c0_1, %c0_2] : memref<16x1xf32, #tpu.memory_space<vmem>>, vector<16x1xf32>
    %cst_3 = arith.constant 0.000000e+00 : f32
    %6 = vector.broadcast %cst_3 : f32 to vector<16x1xf32>
    %7 = arith.maximumf %5, %6 : vector<16x1xf32>
    %8 = math.absf %5 : vector<16x1xf32>
    %cst_4 = arith.constant 0.000000e+00 : f32
    %9 = vector.broadcast %cst_4 : f32 to vector<16x1xf32>
    %10 = arith.subf %9, %8 : vector<16x1xf32>
    %11 = math.exp %10 : vector<16x1xf32>
    %12 = math.log1p %11 : vector<16x1xf32>
    %13 = arith.addf %7, %12 : vector<16x1xf32>
    %cst_5 = arith.constant 0.000000e+00 : f32
    %14 = vector.shape_cast %13 : vector<16x1xf32> to vector<16x1xf32>
    %15 = vector.broadcast %14 : vector<16x1xf32> to vector<16x16xf32>
    %16 = vector.broadcast %cst_5 : f32 to vector<16x16xf32>
    %17 = arith.select %2, %15, %16 : vector<16x16xi1>, vector<16x16xf32>
    %18 = arith.addf %4, %17 : vector<16x16xf32>
    %c0_6 = arith.constant 0 : index
    %c0_7 = arith.constant 0 : index
    %c0_8 = arith.constant 0 : index
    %19 = vector.load %arg4[%c0_6, %c0_7, %c0_8] : memref<5x16x16xf32, #tpu.memory_space<vmem>>, vector<1x16x16xf32>
    %20 = vector.shape_cast %19 : vector<1x16x16xf32> to vector<16x16xf32>
    %21 = vector.shape_cast %18 : vector<16x16xf32> to vector<1x16x16xf32>
    tpu.vector_store %arg4[%c0_6, %c0_7, %c0_8], %21 {strides = array<i32>} : memref<5x16x16xf32, #tpu.memory_space<vmem>>, vector<1x16x16xf32>,
    %c0_9 = arith.constant 0 : index
    %c0_10 = arith.constant 0 : index
    %c0_11 = arith.constant 0 : index
    %22 = vector.load %arg2[%c0_9, %c0_10, %c0_11] : memref<4x16x16xf32, #tpu.memory_space<vmem>>, vector<4x16x16xf32>
    %cst_12 = arith.constant dense<0.000000e+00> : vector<4x16x16xf32>
    %23 = tpu.matmul %22, %22, %cst_12 {dimension_numbers = #tpu.dot_dimension_numbers<[2], [2], [1], [1], [0, 0, 0, 1, 1, 1], [0], [0]>} : vector<4x16x16xf32>, vector<4x16x16xf32>, vector<4x16x16xf32> -> vector<4x16x16xf32>
    %c0_13 = arith.constant 0 : index
    %c0_14 = arith.constant 0 : index
    %c0_15 = arith.constant 0 : index
    %24 = vector.load %arg3[%c0_13, %c0_14, %c0_15] : memref<4x16x1xf32, #tpu.memory_space<vmem>>, vector<4x16x1xf32>
    %cst_16 = arith.constant 0.000000e+00 : f32
    %25 = vector.broadcast %cst_16 : f32 to vector<4x16x1xf32>
    %26 = arith.maximumf %24, %25 : vector<4x16x1xf32>
    %27 = math.absf %24 : vector<4x16x1xf32>
    %cst_17 = arith.constant 0.000000e+00 : f32
    %28 = vector.broadcast %cst_17 : f32 to vector<4x16x1xf32>
    %29 = arith.subf %28, %27 : vector<4x16x1xf32>
    %30 = math.exp %29 : vector<4x16x1xf32>
    %31 = math.log1p %30 : vector<4x16x1xf32>
    %32 = arith.addf %26, %31 : vector<4x16x1xf32>
    %cst_18 = arith.constant 0.000000e+00 : f32
    %33 = vector.shape_cast %2 : vector<16x16xi1> to vector<1x16x16xi1>
    %34 = vector.broadcast %33 : vector<1x16x16xi1> to vector<4x16x16xi1>
    %35 = vector.shape_cast %32 : vector<4x16x1xf32> to vector<4x16x1xf32>
    %36 = vector.broadcast %35 : vector<4x16x1xf32> to vector<4x16x16xf32>
    %37 = vector.broadcast %cst_18 : f32 to vector<4x16x16xf32>
    %38 = arith.select %34, %36, %37 : vector<4x16x16xi1>, vector<4x16x16xf32>
    %39 = arith.addf %23, %38 : vector<4x16x16xf32>
    %c1 = arith.constant 1 : index
    %c0_19 = arith.constant 0 : index
    %c0_20 = arith.constant 0 : index
    %40 = vector.load %arg4[%c1, %c0_19, %c0_20] : memref<5x16x16xf32, #tpu.memory_space<vmem>>, vector<4x16x16xf32>
    tpu.vector_store %arg4[%c1, %c0_19, %c0_20], %39 {strides = array<i32>} : memref<5x16x16xf32, #tpu.memory_space<vmem>>, vector<4x16x16xf32>,
    return
  }
}

</mosaic_0001>

<bundles_post_ra>
// kernel: tpu_custom_call.1
= control target key start
LH: loop header
LB: loop body
LE: loop exit
PB: predicated region body
PF: predicated region fallthrough
CT: control target
= control target key end

     0   :  { %vm71_vm0 = vcmask 130048   ;;  %v867_v11 = vmov 0   ;;  %s1178_s0 = inlined_call_operand.vmem [shape: f32[16,16], index: 0, kind: input, shape index: {}]   ;;  %s1179_s1 = inlined_call_operand.vmem [shape: f32[16,1], index: 1, kind: input, shape index: {}]   ;;  %s1180_s2 = inlined_call_operand.vmem [shape: f32[4,16,16], index: 2, kind: input, shape index: {}]   ;;  %s1181_s3 = inlined_call_operand.vmem [shape: f32[4,16,1], index: 3, kind: input, shape index: {}]   ;;  %s1182_s4 = inlined_call_operand.hbm [shape: f32[5,16,16], index: 4, kind: output, shape index: {}]  }
   0x1   :  { %v25_v0 = vld [vmem:[%s1178_s0] sm:$0xff]  ;;  %v26_v1 = vld [vmem:[%s1178_s0 + $0x8] sm:$0xff]  ;;  %vm907_vm1 = vmpackc.low %vm71_vm0, %vm71_vm0  ;;  %802 = vset.pattern.permute.xlu1 %v867_v11  ;;  %801 = vset.pattern.permute.xlu0 %v867_v11 }
   0x2   :  { %v155_v2 = vld [vmem:[%s1180_s2] sm:$0xff]  ;;  %v767_v3 = vpack.c.bf16 %v26_v1, %v25_v0  ;;  %v156_v5 = vld [vmem:[%s1180_s2 + $0x8] sm:$0xff]  ;;  %736 = vmatprep.mubr.msk.f32.mxu0 %vm71_vm0, %v25_v0  ;;  %v157_v6 = vld [vmem:[%s1180_s2 + $0x10] sm:$0xff] }
   0x3   :  { %743 = vmatprep.mubr.msk.f32.mxu1 %vm71_vm0, %v155_v2  ;;  %v773_v7 = vpack.c.bf16 %v156_v5, %v155_v2  ;;  %v922_v8 = vld [vmem:[%s1180_s2 + $0x18] sm:$0xff]  ;;  %v159_v9 = vld [vmem:[%s1180_s2 + $0x20] sm:$0xff]  ;;  %v930_v10 = vld [vmem:[%s1180_s2 + $0x28] sm:$0xff] }
   0x4   :  { %769 = vmatprep.subr.msk.bf16.mxu0 %vm907_vm1, %v767_v3  ;;  %v779_v12 = vpack.c.bf16 %v922_v8, %v157_v6  ;;  %v785_v13 = vpack.c.bf16 %v930_v10, %v159_v9  ;;  %v939_v14 = vld [vmem:[%s1181_s3] sm:$0xff]  ;;  %v954_v17 = vld [vmem:[%s1181_s3 + $0x8] sm:$0xff]  ;;  %v161_v19 = vld [vmem:[%s1180_s2 + $0x30] sm:$0xff] }
   0x5   :  { %775 = vmatprep.subr.msk.bf16.mxu1 %vm907_vm1, %v773_v7  ;;  %772 = vmatpush3.bf16.xpose.msk.msra.mxu0 %vm907_vm1, %v767_v3  ;;  %v179_v15 = vand.u32 2147483647, %v939_v14  ;;  %v949_v16 = vld [vmem:[%s1179_s1] sm:$0xff]  ;;  %v959_v18 = vld [vmem:[%s1179_s1 + $0x8] sm:$0xff]  ;;  %v180_v21 = vand.u32 2147483647, %v954_v17 }
   0x6   :  { %778 = vmatpush3.bf16.xpose.msk.msra.mxu1 %vm907_vm1, %v773_v7  ;;  %781 = vmatprep.subr.msk.bf16.mxu0 %vm907_vm1, %v779_v12  ;;  %v31_v20 = vand.u32 2147483647, %v949_v16  ;;  %v975_v22 = vld [vmem:[%s1180_s2 + $0x38] sm:$0xff]  ;;  %v32_v24 = vand.u32 2147483647, %v959_v18  ;;  %v986_v26 = vld [vmem:[%s1181_s3 + $0x10] sm:$0xff] }
   0x7   :  { %787 = vmatprep.subr.msk.bf16.mxu1 %vm907_vm1, %v785_v13  ;;  %v187_v23 = vsub.f32 0.0, %v179_v15  ;;  %v981_v25 = vld [vmem:[%s1181_s3 + $0x18] sm:$0xff]  ;;  %v188_v28 = vsub.f32 0.0, %v180_v21  ;;  %v992_v30 = vld [vmem:[%s1181_s3 + $0x28] sm:$0xff]  ;;  %v181_v33 = vand.u32 2147483647, %v986_v26  ;;  %v791_v34 = vpack.c.bf16 %v975_v22, %v161_v19 }
   0x8   :  { %v33_v27 = vsub.f32 0.0, %v31_v20  ;;  %v182_v29 = vand.u32 2147483647, %v981_v25  ;;  %v34_v32 = vsub.f32 0.0, %v32_v24  ;;  %v184_v40 = vand.u32 2147483647, %v992_v30 }
   0x9   :  { %v195_v31 = vmul.f32 1.442695, %v187_v23  ;;  %v197_v36 = vmul.f32 1.442695, %v188_v28  ;;  %v189_v39 = vsub.f32 0.0, %v181_v33  ;;  %v1000_v41 = vld [vmem:[%s1181_s3 + $0x20] sm:$0xff] }
   0xa   :  { %v35_v35 = vmul.f32 1.442695, %v33_v27  ;;  %v190_v37 = vsub.f32 0.0, %v182_v29  ;;  %v37_v38 = vmul.f32 1.442695, %v34_v32  ;;  %v1007_v44 = vld [vmem:[%s1181_s3 + $0x38] sm:$0xff] }
   0xb   :  { %803 = vpow2.f32 %v195_v31  ;;  %v183_v43 = vand.u32 2147483647, %v1000_v41  ;;  %v199_v45 = vmul.f32 1.442695, %v189_v39  ;;  %v192_v46 = vsub.f32 0.0, %v184_v40  ;;  %v1015_v47 = vld [vmem:[%s1181_s3 + $0x30] sm:$0xff] }
   0xc   :  { %737 = vmatmul.mubr.msk.f32.vlgmr.msra.gmra.mrb[0].mxu0 %vm71_vm0, %v26_v1  ;;  %805 = vpow2.f32 %v35_v35  ;;  %v201_v42 = vmul.f32 1.442695, %v190_v37  ;;  %v186_v49 = vand.u32 2147483647, %v1007_v44 }
   0xd   :  { %744 = vmatmul.mubr.msk.f32.vlgmr.msra.gmra.mrb[0].mxu1 %vm71_vm0, %v156_v5  ;;  %784 = vmatpush3.bf16.xpose.msk.msra.mxu0 %vm907_vm1, %v779_v12  ;;  %807 = vpow2.f32 %v197_v36  ;;  %v191_v48 = vsub.f32 0.0, %v183_v43 }
   0xe   :  { %790 = vmatpush3.bf16.xpose.msk.msra.mxu1 %vm907_vm1, %v785_v13  ;;  %750 = vmatprep.mubr.msk.f32.mxu0 %vm71_vm0, %v157_v6  ;;  %809 = vpow2.f32 %v37_v38 }
   0xf   :  { %9 = vsyncpa [#allocation3], 0  ;;  %757 = vmatprep.mubr.msk.f32.mxu1 %vm71_vm0, %v159_v9  ;;  %793 = vmatprep.subr.msk.bf16.mxu0 %vm907_vm1, %v791_v34  ;;  %811 = vpow2.f32 %v201_v42  ;;  %v205_v50 = vmul.f32 1.442695, %v192_v46  ;;  %v185_v51 = vand.u32 2147483647, %v1015_v47 }
  0x10   :  { %v203_v52 = vmul.f32 1.442695, %v191_v48  ;;  %v194_v53 = vsub.f32 0.0, %v186_v49  ;;  %813 = vpow2.f32 %v199_v45  ;;  %v171_v0 = vmax.f32 %v939_v14, 0.0  ;;  %s868_s3 = smov [#allocation2]  }
  0x11   :  { %v193_v54 = vsub.f32 0.0, %v185_v51  ;;  %815 = vpow2.f32 %v205_v50  ;;  %v29_v5 = vmax.f32 %v949_v16, 0.0  ;;  %v172_v4 = vmax.f32 %v954_v17, 0.0  ;;  %s681_s25 = sshll.u32 %s868_s3, 4  ;;  %s682_s25 = int_to_ptr.vmem [resolvable:$true] %s681_s25 }
  0x12   :  { %v209_v55 = vmul.f32 1.442695, %v194_v53  ;;  %817 = vpow2.f32 %v203_v52  ;;  %v30_v7 = vmax.f32 %v959_v18, 0.0  ;;  %v174_v9 = vmax.f32 %v981_v25, 0.0  ;;  %s843_s26 = scalar_lea.vmem %s682_s25, 1280  ;;  %p848_p1 = scmp.lt.s32.totalorder %s682_s25, %s682_s25 }
  0x13   :  { %v207_v56 = vmul.f32 1.442695, %v193_v54  ;;  %v173_v29 = vmax.f32 %v986_v26, 0.0  ;;  %v176_v18 = vmax.f32 %v992_v30, 0.0  ;;  %p844_p0 = scmp.ne.s32.totalorder %s682_s25, %s843_s26  ;;  %p849_p2 = scmp.lt.s32.totalorder %s843_s26, %s843_s26 }
  0x14   :  { %751 = vmatmul.mubr.msk.f32.vlgmr.msra.gmra.mrb[2].mxu0 %vm71_vm0, %v922_v8  ;;  %819 = vpow2.f32 %v209_v55 }
  0x15   :  { %v804_v57 = vpop.eup %803  ;;  %758 = vmatmul.mubr.msk.f32.vlgmr.msra.gmra.mrb[2].mxu1 %vm71_vm0, %v930_v10  ;;  %796 = vmatpush3.bf16.xpose.msk.msra.mxu0 %vm907_vm1, %v791_v34  ;;  %821 = vpow2.f32 %v207_v56  ;;  %p850_p3 = por %p849_p2, %p848_p1 }
  0x16   :  { %v806_v58 = vpop.eup %805  ;;  %764 = vmatprep.mubr.msk.f32.mxu0 %vm71_vm0, %v161_v19  ;;  %v211_v59 = vadd.f32 1.0, %v804_v57  ;;  %v214_v61 = vmul.f32 -0.5, %v804_v57  ;;  %v217_v12 = vand.u32 2147483647, %v804_v57 }
  0x17   :  { %v808_v60 = vpop.eup %807  ;;  %v39_v62 = vadd.f32 1.0, %v806_v58  ;;  %v42_v1 = vmul.f32 -0.5, %v806_v58  ;;  %v45_v13 = vand.u32 2147483647, %v806_v58  ;;  %p851_p4 = pnand %p850_p3, %p844_p0 }
  0x18   :  { %v810_v63 = vpop.eup %809  ;;  %823 = vlog2.f32 %v211_v59  ;;  %v220_v2 = vadd.f32 1.0, %v808_v60  ;;  %v223_v6 = vmul.f32 -0.5, %v808_v60  ;;  %v215_v11 = vadd.f32 1.0, %v214_v61 }
  0x19   :  { %v812_v3 = vpop.eup %811  ;;  %825 = vlog2.f32 %v39_v62  ;;  %v48_v8 = vadd.f32 1.0, %v810_v63  ;;  %v51_v15 = vmul.f32 -0.5, %v810_v63  ;;  %v43_v20 = vadd.f32 1.0, %v42_v1 }
  0x1a   :  { %827 = vlog2.f32 %v220_v2  ;;  %v1037_v10 = vpop.eup %813  ;;  %v238_v21 = vadd.f32 1.0, %v812_v3  ;;  %v241_v23 = vmul.f32 -0.5, %v812_v3  ;;  %v224_v24 = vadd.f32 1.0, %v223_v6 }
  0x1b   :  { %v1039_v19 = vpop.eup %815  ;;  %829 = vlog2.f32 %v48_v8  ;;  %v226_v27 = vand.u32 2147483647, %v808_v60  ;;  %v54_v28 = vand.u32 2147483647, %v810_v63  ;;  %v52_v32 = vadd.f32 1.0, %v51_v15 }
  0x1c   :  { %765 = vmatmul.mubr.msk.f32.vlgmr.msra.gmra.mrb[4].mxu0 %vm71_vm0, %v975_v22  ;;  %v1044_v31 = vpop.eup %817  ;;  %831 = vlog2.f32 %v238_v21  ;;  %v244_v33 = vand.u32 2147483647, %v812_v3  ;;  %v229_v34 = vadd.f32 1.0, %v1037_v10  ;;  %v216_v35 = vmul.f32 %v804_v57, %v215_v11 }
  0x1d   :  { %vm1047_vm2 = vcmp.lt.f32.partialorder %v217_v12, 0.0004427343  ;;  %vm1051_vm3 = vcmp.lt.f32.partialorder %v45_v13, 0.0004427343  ;;  %v256_v37 = vadd.f32 1.0, %v1039_v19  ;;  %v44_v39 = vmul.f32 %v806_v58, %v43_v20 }
  0x1e   :  { %v1056_v38 = vpop.eup %819  ;;  %v242_v40 = vadd.f32 1.0, %v241_v23  ;;  %833 = vlog2.f32 %v229_v34  ;;  %v232_v42 = vmul.f32 -0.5, %v1037_v10  ;;  %v225_v45 = vmul.f32 %v808_v60, %v224_v24 }
  0x1f   :  { %v1059_v43 = vpop.eup %821  ;;  %vm1061_vm4 = vcmp.lt.f32.partialorder %v226_v27, 0.0004427343  ;;  %835 = vlog2.f32 %v256_v37  ;;  %v247_v48 = vadd.f32 1.0, %v1044_v31  ;;  %v53_v50 = vmul.f32 %v810_v63, %v52_v32 }
  0x20   :  { %vm1066_vm5 = vcmp.lt.f32.partialorder %v54_v28, 0.0004427343  ;;  %vm1070_vm6 = vcmp.lt.f32.partialorder %v244_v33, 0.0004427343  ;;  %v259_v53 = vmul.f32 -0.5, %v1039_v19  ;;  %v274_v57 = vadd.f32 1.0, %v1056_v38 }
  0x21   :  { %v235_v56 = vand.u32 2147483647, %v1037_v10  ;;  %837 = vlog2.f32 %v247_v48  ;;  %v243_v60 = vmul.f32 %v812_v3, %v242_v40  ;;  %v233_v61 = vadd.f32 1.0, %v232_v42 }
  0x22   :  { %v824_v49 = vpop.eup %823  ;;  %v250_v62 = vmul.f32 -0.5, %v1044_v31  ;;  %v262_v2 = vand.u32 2147483647, %v1039_v19  ;;  %839 = vlog2.f32 %v274_v57  ;;  %v260_v12 = vadd.f32 1.0, %v259_v53 }
  0x23   :  { %v826_v54 = vpop.eup %825  ;;  %v213_v55 = vmul.f32 0.6931472, %v824_v49  ;;  %v277_v3 = vmul.f32 -0.5, %v1056_v38  ;;  %vm1090_vm7 = vcmp.lt.f32.partialorder %v235_v56, 0.0004427343  ;;  %v265_v27 = vadd.f32 1.0, %v1059_v43 }
  0x24   :  { %v828_v58 = vpop.eup %827  ;;  %v41_v59 = vmul.f32 0.6931472, %v826_v54  ;;  %v251_v24 = vadd.f32 1.0, %v250_v62  ;;  %vm1100_vm8 = vcmp.lt.f32.partialorder %v262_v2, 0.0004427343  ;;  %v268_v37 = vmul.f32 -0.5, %v1059_v43 }
  0x25   :  { %v219_v63 = vsel %vm1047_vm2, %v216_v35, %v213_v55  ;;  %v222_v1 = vmul.f32 0.6931472, %v828_v58  ;;  %v830_v6 = vpop.eup %829  ;;  %v253_v32 = vand.u32 2147483647, %v1044_v31  ;;  %841 = vlog2.f32 %v265_v27 }
  0x26   :  { %v283_v8 = vadd.f32 %v219_v63, %v171_v0  ;;  %v47_v11 = vsel %vm1051_vm3, %v44_v39, %v41_v59  ;;  %v50_v20 = vmul.f32 0.6931472, %v830_v6  ;;  %v832_v23 = vpop.eup %831  ;;  %v234_v0 = vmul.f32 %v1037_v10, %v233_v61 }
  0x27   :  { %v57_v13 = vadd.f32 %v47_v11, %v29_v5  ;;  %v228_v15 = vsel %vm1061_vm4, %v225_v45, %v222_v1  ;;  %v240_v5 = vmul.f32 0.6931472, %v832_v23  ;;  %v278_v10 = vadd.f32 1.0, %v277_v3 }
  0x28   :  { %297 = vperm.xlu1 %802, %v283_v8   ;;  %v284_v14 = vadd.f32 %v228_v15, %v172_v4  ;;  %v56_v16 = vsel %vm1066_vm5, %v53_v50, %v50_v20  ;;  %v834_v33 = vpop.eup %833  ;;  %v261_v4 = vmul.f32 %v1039_v19, %v260_v12  ;;  %v280_v22 = vand.u32 2147483647, %v1056_v38 }
  0x29   :  { %61 = vperm.xlu0 %801, %v57_v13   ;;  %v58_v17 = vadd.f32 %v56_v16, %v30_v7  ;;  %v836_v34 = vpop.eup %835  ;;  %v246_v35 = vsel %vm1070_vm6, %v243_v60, %v240_v5  ;;  %v231_v36 = vmul.f32 0.6931472, %v834_v33  ;;  %v252_v19 = vmul.f32 %v1044_v31, %v251_v24 }
  0x2a   :  { %v286_v39 = vadd.f32 %v246_v35, %v174_v9  ;;  %v258_v7 = vmul.f32 0.6931472, %v836_v34  ;;  %v175_v45 = vmax.f32 %v1000_v41, 0.0  ;;  %vm254_vm9 = vcmp.lt.f32.partialorder %v253_v32, 0.0004427343 }
  0x2b   :  { %v838_v40 = vpop.eup %837  ;;  %v237_v42 = vsel %vm1090_vm7, %v234_v0, %v231_v36  ;;  %v279_v30 = vmul.f32 %v1056_v38, %v278_v10  ;;  %v178_v31 = vmax.f32 %v1007_v44, 0.0  ;;  %vm281_vm10 = vcmp.lt.f32.partialorder %v280_v22, 0.0004427343 }
  0x2c   :  { %302 = vperm.xlu1 %802, %v284_v14   ;;  %v285_v46 = vadd.f32 %v237_v42, %v173_v29  ;;  %v264_v25 = vsel %vm1100_vm8, %v261_v4, %v258_v7  ;;  %v249_v9 = vmul.f32 0.6931472, %v838_v40  ;;  %v840_v48 = vpop.eup %839  ;;  %v269_v49 = vadd.f32 1.0, %v268_v37 }
  0x2d   :  { %66 = vperm.xlu0 %801, %v58_v17   ;;  %v288_v50 = vadd.f32 %v264_v25, %v176_v18  ;;  %v276_v52 = vmul.f32 0.6931472, %v840_v48  ;;  %v271_v41 = vand.u32 2147483647, %v1059_v43  ;;  %v177_v38 = vmax.f32 %v1015_v47, 0.0 }
  0x2e   :  { %v255_v51 = vsel %vm254_vm9, %v252_v19, %v249_v9  ;;  %v270_v53 = vmul.f32 %v1059_v43, %v269_v49  ;;  %v18_v58 = vlaneseq }
  0x2f   :  { %v287_v26 = vadd.f32 %v255_v51, %v175_v45  ;;  %v282_v29 = vsel %vm281_vm10, %v279_v30, %v276_v52  ;;  %v842_v54 = vpop.eup %841  ;;  %vm272_vm11 = vcmp.lt.f32.partialorder %v271_v41, 0.0004427343 }
  0x30   :  { %312 = vperm.xlu1 %802, %v286_v39   ;;  %v290_v55 = vadd.f32 %v282_v29, %v178_v31  ;;  %v267_v44 = vmul.f32 0.6931472, %v842_v54  ;;  %v19_v59 = vshrl.u32 %v18_v58, 7  ;;  %v22_v62 = vand.u32 127, %v18_v58 }
  0x31   :  { %307 = vperm.xlu0 %801, %v285_v46  }
  0x32   :  { %v273_v56 = vsel %vm272_vm11, %v270_v53, %v267_v44  ;;  %v20_v63 = vadd.s32 8, %v19_v59  ;;  %vm1132_vm13 = vcmp.eq.s32.totalorder %v19_v59, %v22_v62 }
  0x33   :  { %v289_v57 = vadd.f32 %v273_v56, %v177_v38 }
  0x34   :  { %322 = vperm.xlu1 %802, %v288_v50   ;;  %vm1128_vm12 = vcmp.eq.s32.totalorder %v20_v63, %v22_v62 }
  0x35   :  { %317 = vperm.xlu0 %801, %v287_v26  }
  0x38   :  { %332 = vperm.xlu1 %802, %v290_v55  }
  0x39   :  { %327 = vperm.xlu0 %801, %v289_v57  }
  0xa7   :  { %v298_v60 = vpop.permute.xlu1 %297 }
  0xa8   :  { %v62_v61 = vpop.permute.xlu0 %61  ;;  %v335_v12 = vsel %vm1132_vm13, %v298_v60, 0.0 }
  0xa9   :  { %v69_v8 = vsel %vm1132_vm13, %v62_v61, 0.0 }
  0xab   :  { %v303_v1 = vpop.permute.xlu1 %302 }
  0xac   :  { %v67_v2 = vpop.permute.xlu0 %66  ;;  %v336_v11 = vsel %vm1128_vm12, %v303_v1, 0.0 }
  0xad   :  { %v70_v6 = vsel %vm1128_vm12, %v67_v2, 0.0 }
  0xaf   :  { %v313_v3 = vpop.permute.xlu1 %312 }
  0xb0   :  { %v308_v23 = vpop.permute.xlu0 %307  ;;  %v338_v5 = vsel %vm1128_vm12, %v313_v3, 0.0 }
  0xb1   :  { %v337_v33 = vsel %vm1132_vm13, %v308_v23, 0.0 }
  0xb3   :  { %v323_v16 = vpop.permute.xlu1 %322 }
  0xb4   :  { %v318_v28 = vpop.permute.xlu0 %317  ;;  %v340_v17 = vsel %vm1128_vm12, %v323_v16, 0.0 }
  0xb5   :  { %v339_v35 = vsel %vm1132_vm13, %v318_v28, 0.0 }
  0xb7   :  { %v333_v18 = vpop.permute.xlu1 %332 }
  0xb8   :  { %v328_v7 = vpop.permute.xlu0 %327  ;;  %v342_v19 = vsel %vm1128_vm12, %v333_v18, 0.0 }
  0xb9   :  { %v341_v42 = vsel %vm1132_vm13, %v328_v7, 0.0 }
  0xdf   :  { %v738_v13 = vpop.f32.mrb[0].mxu0 }
  0xe0   :  { %v745_v15 = vpop.f32.mrb[0].mxu1  ;;  %v150_v20 = vadd.f32 %v738_v13, %v70_v6  ;;  %v144_v21 = vpop.f32.mrb[1].mxu0 }
  0xe1   :  { %v421_v14 = vadd.f32 %v745_v15, %v336_v11  ;;  %v145_v0 = vadd.f32 %v144_v21, %v69_v8  ;;  %v415_v24 = vpop.f32.mrb[1].mxu1 }
  0xe2   :  { %154 = vst.msk [vmem:[#allocation2 + $0x8] sm:$0xff] %vm71_vm0, %v150_v20  ;;  %v416_v27 = vadd.f32 %v415_v24, %v335_v12 }
  0xe3   :  { %669 = vst.msk [vmem:[#allocation2 + $0x18] sm:$0xff] %vm71_vm0, %v421_v14  ;;  %153 = vst.msk [vmem:[#allocation2] sm:$0xff] %vm71_vm0, %v145_v0 }
  0xe4   :  { %668 = vst.msk [vmem:[#allocation2 + $0x10] sm:$0xff] %vm71_vm0, %v416_v27 }
  0xe7   :  { %v752_v32 = vpop.f32.mrb[2].mxu0 }
  0xe8   :  { %v502_v4 = vadd.f32 %v752_v32, %v338_v5  ;;  %v759_v10 = vpop.f32.mrb[2].mxu1  ;;  %v496_v34 = vpop.f32.mrb[3].mxu0 }
  0xe9   :  { %v583_v36 = vadd.f32 %v759_v10, %v340_v17  ;;  %v497_v22 = vadd.f32 %v496_v34, %v337_v33  ;;  %v577_v37 = vpop.f32.mrb[3].mxu1 }
  0xea   :  { %671 = vst.msk [vmem:[#allocation2 + $0x28] sm:$0xff] %vm71_vm0, %v502_v4  ;;  %v578_v39 = vadd.f32 %v577_v37, %v339_v35 }
  0xeb   :  { %673 = vst.msk [vmem:[#allocation2 + $0x38] sm:$0xff] %vm71_vm0, %v583_v36  ;;  %670 = vst.msk [vmem:[#allocation2 + $0x20] sm:$0xff] %vm71_vm0, %v497_v22 }
  0xec   :  { %672 = vst.msk [vmem:[#allocation2 + $0x30] sm:$0xff] %vm71_vm0, %v578_v39 }
  0xef   :  { %v766_v40 = vpop.f32.mrb[4].mxu0 }
  0xf0   :  { %v664_v45 = vadd.f32 %v766_v40, %v342_v19  ;;  %v658_v46 = vpop.f32.mrb[5].mxu0 }
  0xf1   :  { %v659_v25 = vadd.f32 %v658_v46, %v341_v42 }
  0xf2   :  { %675 = vst.msk [vmem:[#allocation2 + $0x48] sm:$0xff] %vm71_vm0, %v664_v45 }
  0xf3   :  { %674 = vst.msk [vmem:[#allocation2 + $0x40] sm:$0xff] %vm71_vm0, %v659_v25 }
  0xf4   :  { %854 = shalt.err (!%p851_p4)
}
  0xf5   :  { %s855_s29 = scalar_lea.hbm %s1182_s4, 1280 }
  0xf6   :  { %p856_p5 = scmp.ne.s32.totalorder %s1182_s4, %s855_s29  ;;  %p859_p6 = scmp.lt.u32.totalorder %s855_s29, %s1182_s4 }
  0xf8   :  { %p861_p7 = pnand %p859_p6, %p856_p5 }
  0xfa   :  { %864 = shalt.err (!%p861_p7)
}
  0xfb   :  { %s869_s8 = smov 128   ;;  %s870_s9 = smov 8  }
  0xfc   :  { %687 = dma.vmem_to_hbm [thread:$0]  %s682_s25, 1280, %s1182_s4, [#allocation3], %s869_s8, %s869_s8, %s870_s9  }
  0xfd   :  { %865 = dma.done.wait [#allocation3], 1280  }
  0xfe   :  { %866 = vsyncadd [#allocation3], 4294966016 }
  0xff   :  { %691 = vsyncpa [#allocation3], 1 }

</bundles_post_ra>
